<compile_context>
chip_gen: v6e
topology: v6e:2x2x1
jax: 0.10.0
libtpu: 0.0.40
codegen_flags: <defaults>
</compile_context>

<pallas_src>
import math
from typing import NamedTuple

import jax
import jax.numpy as jnp
from jax.experimental import pallas as pl
from jax.experimental.pallas import tpu as pltpu

_LANE = 128
_VMEM_BUDGET = 36 * 1024 * 1024   # conservative tile-selection budget (all gens)
_VMEM_LIMIT = 48 * 1024 * 1024    # scoped VMEM limit handed to Mosaic


def _round_up(x, m):
    return (x + m - 1) // m * m


def _shrink_lane(t):
    """Next smaller lane-aligned tile size (>= 128)."""
    return max(_LANE, (t // 2) // _LANE * _LANE)


class _Tiling(NamedTuple):
    fused: bool    # True -> single K block (weight panel resident in VMEM)
    tm_cap: int    # upper bound on the M tile (actual tm <= tm_cap)
    tn: int        # V tile
    tk: int        # F tile (== F_pad when fused)
    F_pad: int
    V_pad: int


def _fused_footprint(tm, tn, f_pad, out_bytes):
    # double-buffered x / W / bias input blocks + double-buffered output block
    return (2 * tm * f_pad * 2        # x   (bf16)
            + 2 * f_pad * tn * 2      # W   (bf16, resident but 2 bufs allocated)
            + 2 * tn * 4              # bias (f32)
            + 2 * tm * tn * out_bytes)


def _ksplit_footprint(tm, tn, tk, out_bytes):
    return (2 * tm * tk * 2 + 2 * tk * tn * 2 + 2 * tn * 4
            + 2 * tm * tn * out_bytes + tm * tn * 4)   # + f32 acc scratch


def _head_tiling(F, V, *, tm_target=256, tn_target=1024,
                 vmem_budget=_VMEM_BUDGET):
    """Tile / padding selection. Independent of M so init and call agree."""
    out_bytes = 4                              # budget for worst-case f32 logits
    f_lane = _round_up(F, _LANE)
    tn0 = min(_round_up(tn_target, _LANE), _round_up(V, _LANE))

    # --- preferred: fused reduction (tk = F_pad), weight panel resident ---
    tm, tn = tm_target, tn0
    while _fused_footprint(tm, tn, f_lane, out_bytes) > vmem_budget and tn > _LANE:
        tn = _shrink_lane(tn)
    while _fused_footprint(tm, tn, f_lane, out_bytes) > vmem_budget and tm > 16:
        tm = max(16, tm // 2)
    if _fused_footprint(tm, tn, f_lane, out_bytes) <= vmem_budget:
        return _Tiling(True, tm, tn, f_lane, f_lane, _round_up(V, tn))

    # --- fallback: k-split reduction with f32 accumulator scratch ---
    tm, tn, tk = tm_target, tn0, min(512, f_lane)
    while _ksplit_footprint(tm, tn, tk, out_bytes) > vmem_budget and tk > _LANE:
        tk = _shrink_lane(tk)
    while _ksplit_footprint(tm, tn, tk, out_bytes) > vmem_budget and tn > _LANE:
        tn = _shrink_lane(tn)
    while _ksplit_footprint(tm, tn, tk, out_bytes) > vmem_budget and tm > 16:
        tm = max(16, tm // 2)
    return _Tiling(False, tm, tn, tk, _round_up(F, tk), _round_up(V, tn))


# ---------------------------------------------------------------------------
# Kernels
# ---------------------------------------------------------------------------

def _head_kernel_fused(x_ref, w_ref, b_ref, o_ref):
    """One (tm, tn) logits tile; full F reduction in a single MXU pass."""
    o_ref[...] = (jnp.dot(x_ref[...], w_ref[...],
                          preferred_element_type=jnp.float32)
                  + b_ref[...]).astype(o_ref.dtype)


def _head_kernel_ksplit(x_ref, w_ref, b_ref, o_ref, acc_ref):
    """Fallback: grid axis 2 walks the F reduction with a VMEM f32 accumulator."""
    k = pl.program_id(2)

    @pl.when(k == 0)
    def _init():
        acc_ref[...] = jnp.zeros_like(acc_ref)

    acc_ref[...] += jnp.dot(x_ref[...], w_ref[...],
                            preferred_element_type=jnp.float32)

    @pl.when(k == pl.num_programs(2) - 1)
    def _finalize():
        o_ref[...] = (acc_ref[...] + b_ref[...]).astype(o_ref.dtype)


# ---------------------------------------------------------------------------
# Host-side wrappers
# ---------------------------------------------------------------------------

def prepare_head_params(weight, bias, *, compute_dtype=jnp.bfloat16,
                        **tiling_kwargs):
    """weight: (V, F) [PyTorch nn.Linear layout]; bias: (V,).

    Returns (w_t, b2d): pre-transposed, zero-padded, compute-dtype weight
    (F_pad, V_pad) and f32 bias (1, V_pad). Done once at init.
    """
    V, F = weight.shape
    t = _head_tiling(F, V, **tiling_kwargs)
    w_t = weight.T.astype(compute_dtype)
    if (t.F_pad, t.V_pad) != (F, V):
        w_t = jnp.pad(w_t, ((0, t.F_pad - F), (0, t.V_pad - V)))
    b2d = bias.astype(jnp.float32).reshape(1, V)
    if t.V_pad != V:
        b2d = jnp.pad(b2d, ((0, 0), (0, t.V_pad - V)))
    return w_t, b2d


def linear_head(features, w_prepared, b_prepared, vocab_size, *,
                compute_dtype=jnp.bfloat16, out_dtype=None, **tiling_kwargs):
    """features: (..., F); w_prepared: (F_pad, V_pad); b_prepared: (1, V_pad)."""
    lead = list(features.shape[:-1])
    F = features.shape[-1]
    M = math.prod(lead) if lead else 1

    t = _head_tiling(F, vocab_size, **tiling_kwargs)
    assert w_prepared.shape == (t.F_pad, t.V_pad), (w_prepared.shape, t)
    assert b_prepared.shape == (1, t.V_pad), (b_prepared.shape, t)

    # bf16 logits halve writeback traffic; default follows the feature dtype.
    out_dtype = features.dtype if out_dtype is None else out_dtype
    out_bytes = jnp.dtype(out_dtype).itemsize

    tm = min(t.tm_cap, _round_up(M, 16))     # 16-aligned for bf16 sublane packing
    M_pad = _round_up(M, tm)

    x2d = features.reshape(M, F).astype(compute_dtype)
    if (M_pad, t.F_pad) != (M, F):
        # single pad op; F padded with zeros (reduction-safe), M rows sliced off
        x2d = jnp.pad(x2d, ((0, M_pad - M), (0, t.F_pad - F)))

    nm, nv = M_pad // tm, t.V_pad // t.tn

    if t.fused:
        w_bytes = t.F_pad * t.V_pad * 2
        x_bytes = M_pad * t.F_pad * 2
        w_resident_traffic = w_bytes + nv * x_bytes   # grid (j outer, i inner)
        x_resident_traffic = x_bytes + nm * w_bytes   # grid (i outer, j inner)
        if w_resident_traffic <= x_resident_traffic:
            # Weight panel index depends only on the outer axis j -> constant
            # across consecutive inner steps, so Pallas skips the re-DMA and
            # W is streamed from HBM exactly once.
            grid = (nv, nm)
            in_specs = [
                pl.BlockSpec((tm, t.F_pad), lambda j, i: (i, 0)),
                pl.BlockSpec((t.F_pad, t.tn), lambda j, i: (0, j)),
                pl.BlockSpec((1, t.tn), lambda j, i: (0, j)),
            ]
            out_spec = pl.BlockSpec((tm, t.tn), lambda j, i: (i, j))
            bytes_in = w_resident_traffic
        else:
            # Activation panel resident instead (M stream dominates).
            grid = (nm, nv)
            in_specs = [
                pl.BlockSpec((tm, t.F_pad), lambda i, j: (i, 0)),
                pl.BlockSpec((t.F_pad, t.tn), lambda i, j: (0, j)),
                pl.BlockSpec((1, t.tn), lambda i, j: (0, j)),
            ]
            out_spec = pl.BlockSpec((tm, t.tn), lambda i, j: (i, j))
            bytes_in = x_resident_traffic
        kernel = _head_kernel_fused
        scratch_shapes = []
        dims = ("parallel", "parallel")
    else:
        nk = t.F_pad // t.tk
        grid = (nm, nv, nk)
        in_specs = [
            pl.BlockSpec((tm, t.tk), lambda i, j, k: (i, k)),
            pl.BlockSpec((t.tk, t.tn), lambda i, j, k: (k, j)),
            pl.BlockSpec((1, t.tn), lambda i, j, k: (0, j)),
        ]
        out_spec = pl.BlockSpec((tm, t.tn), lambda i, j, k: (i, j))
        kernel = _head_kernel_ksplit
        scratch_shapes = [pltpu.VMEM((tm, t.tn), jnp.float32)]
        dims = ("parallel", "parallel", "arbitrary")
        bytes_in = nv * M_pad * t.F_pad * 2 + nm * t.F_pad * t.V_pad * 2

    flops = 2 * M_pad * t.V_pad * t.F_pad
    bytes_accessed = bytes_in + t.V_pad * 4 + M_pad * t.V_pad * out_bytes

    out = pl.pallas_call(
        kernel,
        out_shape=jax.ShapeDtypeStruct((M_pad, t.V_pad), out_dtype),
        grid_spec=pltpu.PrefetchScalarGridSpec(
            num_scalar_prefetch=0,
            grid=grid,
            in_specs=in_specs,
            out_specs=out_spec,
            scratch_shapes=scratch_shapes,
        ),
        compiler_params=pltpu.CompilerParams(
            dimension_semantics=dims,
            vmem_limit_bytes=_VMEM_LIMIT),
        cost_estimate=pl.CostEstimate(
            flops=flops, transcendentals=0, bytes_accessed=bytes_accessed),
    )(x2d, w_prepared, b_prepared)

    out = out[:M, :vocab_size]
    return out.reshape(*lead, vocab_size)


class BaseRecognizerPallas:
    def __init__(self, feature_size, vocab_size, key, *,
                 compute_dtype=jnp.bfloat16):
        kw, kb = jax.random.split(key)
        # Deterministic init mimicking torch.nn.Linear uniform(-1/sqrt(F), 1/sqrt(F)).
        bound = 1.0 / (feature_size ** 0.5)
        self.weight = jax.random.uniform(
            kw, (vocab_size, feature_size), jnp.float32, -bound, bound)
        self.bias = jax.random.uniform(
            kb, (vocab_size,), jnp.float32, -bound, bound)
        self.vocab_size = vocab_size
        self.compute_dtype = compute_dtype
        # Pre-transposed / padded / cast kernel weight, built once at init.
        self.w_prepared, self.b_prepared = prepare_head_params(
            self.weight, self.bias, compute_dtype=compute_dtype)

    def _get_features(self, inputs):
        # TODO(synk): abstract in the reference module (raises NotImplementedError);
        # identity pass-through used here.
        return inputs

    def forward(self, inputs):
        features = self._get_features(inputs)
        logits = linear_head(features, self.w_prepared, self.b_prepared,
                             self.vocab_size, compute_dtype=self.compute_dtype)
        return (logits, features)


def _bf16_ref(x, w, b):
    """Reference with the same bf16-rounded operands and f32 accumulation."""
    xb = x.astype(jnp.bfloat16).astype(jnp.float32)
    wb = w.astype(jnp.bfloat16).astype(jnp.float32)
    return jnp.einsum("...f,vf->...v", xb, wb,
                      precision=jax.lax.Precision.HIGHEST) + b


if __name__ == "__main__":
    key = jax.random.PRNGKey(0)
    k_in, k_param, k_in2, k_w3, k_b3, k_x3 = jax.random.split(key, 6)

    # --- Test 1: small single-tile forward (module-shaped example) ----------
    B, T, FEAT, VOCAB = 2, 8, 32, 128
    inputs = jax.random.normal(k_in, (B, T, FEAT), jnp.float32)

    model = BaseRecognizerPallas(FEAT, VOCAB, k_param)
    logits, features = model.forward(inputs)
    jax.block_until_ready(logits)
    jax.block_until_ready(features)

    assert logits.shape == (B, T, VOCAB)
    assert features.shape == (B, T, FEAT)
    ref = _bf16_ref(features, model.weight, model.bias)
    assert jnp.allclose(logits, ref, atol=2e-3, rtol=2e-3), \
        float(jnp.max(jnp.abs(logits - ref)))

    # --- Test 2: multi-tile M, non-multiple F/V (padding + slicing paths) ---
    B2, T2, F2, V2 = 2, 150, 200, 384
    model2 = BaseRecognizerPallas(F2, V2, k_param)
    inputs2 = jax.random.normal(k_in2, (B2, T2, F2), jnp.float32)
    logits2, feats2 = model2.forward(inputs2)
    jax.block_until_ready(logits2)
    assert logits2.shape == (B2, T2, V2)
    ref2 = _bf16_ref(feats2, model2.weight, model2.bias)
    assert jnp.allclose(logits2, ref2, atol=2e-3, rtol=2e-3), \
        float(jnp.max(jnp.abs(logits2 - ref2)))

    # --- Test 3: force the k-split fallback (tiny budget) -------------------
    F3, V3, M3 = 200, 384, 40
    w3 = jax.random.normal(k_w3, (V3, F3), jnp.float32) * 0.1
    b3 = jax.random.normal(k_b3, (V3,), jnp.float32) * 0.1
    x3 = jax.random.normal(k_x3, (M3, F3), jnp.float32)
    tiny = dict(vmem_budget=1)  # guarantees the fused panel "does not fit"
    w3p, b3p = prepare_head_params(w3, b3, **tiny)
    out3 = linear_head(x3, w3p, b3p, V3, **tiny)
    jax.block_until_ready(out3)
    ref3 = _bf16_ref(x3, w3, b3)
    assert out3.shape == (M3, V3)
    assert jnp.allclose(out3, ref3, atol=2e-3, rtol=2e-3), \
        float(jnp.max(jnp.abs(out3 - ref3)))

    print("KERNEL_OK")
</pallas_src>

<mosaic_0001>
module attributes {stable_mosaic.version = 11 : i64} {
  func.func @_head_kernel_fused(%arg0: i32, %arg1: i32, %arg2: memref<16x128xbf16, #tpu.memory_space<vmem>>, %arg3: memref<128x128xbf16, #tpu.memory_space<vmem>>, %arg4: memref<1x128xf32, #tpu.memory_space<vmem>>, %arg5: memref<16x128xf32, #tpu.memory_space<vmem>>) attributes {dimension_semantics = [#tpu.dimension_semantics<parallel>, #tpu.dimension_semantics<parallel>], iteration_bounds = array<i64: 1, 1>, scalar_prefetch = 0 : i64, scratch_operands = 0 : i64, tpu.core_type = #tpu.core_type<tc>, window_params = [{transform_indices = @transform_0, window_bounds = array<i64: 16, 128>}, {transform_indices = @transform_1, window_bounds = array<i64: 128, 128>}, {transform_indices = @transform_2, window_bounds = array<i64: 1, 128>}, {transform_indices = @transform_3, window_bounds = array<i64: 16, 128>}]} {
    %c0 = arith.constant 0 : index
    %c0_0 = arith.constant 0 : index
    %0 = vector.load %arg2[%c0, %c0_0] : memref<16x128xbf16, #tpu.memory_space<vmem>>, vector<16x128xbf16>
    %c0_1 = arith.constant 0 : index
    %c0_2 = arith.constant 0 : index
    %1 = vector.load %arg3[%c0_1, %c0_2] : memref<128x128xbf16, #tpu.memory_space<vmem>>, vector<128x128xbf16>
    %cst = arith.constant dense<0.000000e+00> : vector<16x128xf32>
    %2 = tpu.matmul %0, %1, %cst {dimension_numbers = #tpu.dot_dimension_numbers<[1], [0], [0], [1], [0, 0, 1, 1], [], []>} : vector<16x128xbf16>, vector<128x128xbf16>, vector<16x128xf32> -> vector<16x128xf32>
    %c0_3 = arith.constant 0 : index
    %c0_4 = arith.constant 0 : index
    %3 = vector.load %arg4[%c0_3, %c0_4] : memref<1x128xf32, #tpu.memory_space<vmem>>, vector<1x128xf32>
    %4 = vector.broadcast %3 : vector<1x128xf32> to vector<16x128xf32>
    %5 = arith.addf %2, %4 : vector<16x128xf32>
    %c0_5 = arith.constant 0 : index
    %c0_6 = arith.constant 0 : index
    %6 = vector.load %arg5[%c0_5, %c0_6] : memref<16x128xf32, #tpu.memory_space<vmem>>, vector<16x128xf32>
    tpu.vector_store %arg5[%c0_5, %c0_6], %5 {strides = array<i32>} : memref<16x128xf32, #tpu.memory_space<vmem>>, vector<16x128xf32>,
    return
  }
  func.func @transform_0(%arg0: i32, %arg1: i32) -> (i32, i32) {
    %c0_i32 = arith.constant 0 : i32
    %c0_i32_0 = arith.constant 0 : i32
    return %arg1, %c0_i32 : i32, i32
  }
  func.func @transform_1(%arg0: i32, %arg1: i32) -> (i32, i32) {
    %c0_i32 = arith.constant 0 : i32
    %c0_i32_0 = arith.constant 0 : i32
    return %c0_i32, %arg0 : i32, i32
  }
  func.func @transform_2(%arg0: i32, %arg1: i32) -> (i32, i32) {
    %c0_i32 = arith.constant 0 : i32
    %c0_i32_0 = arith.constant 0 : i32
    return %c0_i32, %arg0 : i32, i32
  }
  func.func @transform_3(%arg0: i32, %arg1: i32) -> (i32, i32) {
    %c0_i32 = arith.constant 0 : i32
    return %arg1, %arg0 : i32, i32
  }
}

</mosaic_0001>

<bundles_post_ra>
// kernel: tpu_custom_call.1
= control target key start
LH: loop header
LB: loop body
LE: loop exit
PB: predicated region body
PF: predicated region fallthrough
CT: control target
= control target key end

     0   :  { %8 = vsyncpa [#allocation3], 0  ;;  %s348_s0 = inlined_call_operand.hbm [shape: bf16[16,128], index: 0, kind: input, shape index: {}]   ;;  %s349_s1 = inlined_call_operand.hbm [shape: bf16[128,128], index: 1, kind: input, shape index: {}]   ;;  %s350_s2 = inlined_call_operand.vmem [shape: f32[1,128], index: 2, kind: input, shape index: {}]   ;;  %s351_s3 = inlined_call_operand.hbm [shape: f32[16,128], index: 3, kind: output, shape index: {}]  }
   0x1   :  { %9 = vsyncpa [#allocation6], 0 }
   0x2   :  { %10 = vsyncpa [#allocation4], 0  ;;  %s307_s12 = smov [#allocation2]  }
   0x3   :  { %s16_s13 = sshll.u32 %s307_s12, 4  ;;  %s17_s13 = int_to_ptr.vmem [resolvable:$true] %s16_s13 }
   0x4   :  { %s249_s14 = scalar_lea.vmem %s17_s13, 128  ;;  %p254_p1 = scmp.lt.s32.totalorder %s17_s13, %s17_s13 }
   0x5   :  { %p250_p0 = scmp.ne.s32.totalorder %s17_s13, %s249_s14  ;;  %p255_p2 = scmp.lt.s32.totalorder %s249_s14, %s249_s14 }
   0x7   :  { %p256_p3 = por %p255_p2, %p254_p1 }
   0x9   :  { %p257_p4 = pnand %p256_p3, %p250_p0 }
   0xb   :  { %260 = shalt.err (!%p257_p4)
}
   0xc   :  { %s308_s15 = smov 64   ;;  %s309_s16 = smov 4  }
   0xd   :  { %22 = dma.hbm_to_vmem [thread:$0]  %s348_s0, 128, %s17_s13, [#allocation3], %s308_s15, %s308_s15, %s309_s16  }
   0xe   :  { %s310_s19 = smov [#allocation5]  }
   0xf   :  { %s28_s20 = sshll.u32 %s310_s19, 4  ;;  %s29_s20 = int_to_ptr.vmem [resolvable:$true] %s28_s20 }
  0x10   :  { %s269_s21 = scalar_lea.vmem %s29_s20, 1024  ;;  %p274_p6 = scmp.lt.s32.totalorder %s29_s20, %s29_s20 }
  0x11   :  { %p270_p5 = scmp.ne.s32.totalorder %s29_s20, %s269_s21  ;;  %p275_p7 = scmp.lt.s32.totalorder %s269_s21, %s269_s21 }
  0x13   :  { %p276_p8 = por %p275_p7, %p274_p6 }
  0x15   :  { %p277_p9 = pnand %p276_p8, %p270_p5 }
  0x17   :  { %280 = shalt.err (!%p277_p9)
}
  0x18   :  { %34 = dma.hbm_to_vmem [thread:$0]  %s349_s1, 1024, %s29_s20, [#allocation6], %s308_s15, %s308_s15, %s309_s16  }
  0x19   :  { %301 = dma.done.wait [#allocation3], 128  }
  0x1a   :  { %302 = vsyncadd [#allocation3], 4294967168 }
  0x1b   :  { %303 = dma.done.wait [#allocation6], 1024  }
  0x1c   :  { %304 = vsyncadd [#allocation6], 4294966272  ;;  %v311_v0 = vmov 0.0   ;;  %vm312_vm0 = vmmov 0   ;;  %v232_v1 = vld [vmem:[#allocation5 + $0x38] sm:$0xff]   ;;  %v233_v2 = vld [vmem:[#allocation5 + $0x30] sm:$0xff]  }
  0x1d   :  { %203 = vmatprep.subr.bf16.mxu0 %v311_v0  ;;  %219 = vmatprep.mubr.msk.bf16.mxu0 %vm312_vm0, %v311_v0  ;;  %v234_v3 = vld [vmem:[#allocation5 + $0x28] sm:$0xff]   ;;  %v235_v4 = vld [vmem:[#allocation5 + $0x20] sm:$0xff]   ;;  %v236_v5 = vld [vmem:[#allocation5 + $0x18] sm:$0xff]   ;;  %s313_s24 = smov [#allocation7]  }
  0x1e   :  { %204 = vmatpush3.bf16.msra.mxu0 %v232_v1  ;;  %v237_v6 = vld [vmem:[#allocation5 + $0x10] sm:$0xff]   ;;  %v238_v7 = vld [vmem:[#allocation5 + $0x8] sm:$0xff]   ;;  %v239_v8 = vld [vmem:[#allocation5] sm:$0xff]   ;;  %s171_s25 = sshll.u32 %s313_s24, 4  ;;  %s172_s25 = int_to_ptr.vmem [resolvable:$true] %s171_s25 }
  0x1f   :  { %205 = vmatprep.subr.bf16.mxu0 %v311_v0  ;;  %v240_v9 = vld [vmem:[#allocation2] sm:$0xff]   ;;  %s281_s26 = scalar_lea.vmem %s172_s25, 256  ;;  %p286_p11 = scmp.lt.s32.totalorder %s172_s25, %s172_s25 }
  0x20   :  { %v184_v10 = vld [vmem:[%s350_s2] ss:$0 sm:$0xff]  ;;  %p282_p10 = scmp.ne.s32.totalorder %s172_s25, %s281_s26  ;;  %p287_p12 = scmp.lt.s32.totalorder %s281_s26, %s281_s26 }
  0x22   :  { %206 = vmatpush3.bf16.msra.mxu0 %v233_v2  ;;  %p288_p13 = por %p287_p12, %p286_p11 }
  0x23   :  { %207 = vmatprep.subr.bf16.mxu0 %v311_v0 }
  0x24   :  { %p289_p0 = pnand %p288_p13, %p282_p10 }
  0x26   :  { %208 = vmatpush3.bf16.msra.mxu0 %v234_v3 }
  0x27   :  { %209 = vmatprep.subr.bf16.mxu0 %v311_v0 }
  0x2a   :  { %210 = vmatpush3.bf16.msra.mxu0 %v235_v4 }
  0x2b   :  { %211 = vmatprep.subr.bf16.mxu0 %v311_v0 }
  0x2e   :  { %212 = vmatpush3.bf16.msra.mxu0 %v236_v5 }
  0x2f   :  { %213 = vmatprep.subr.bf16.mxu0 %v311_v0 }
  0x32   :  { %214 = vmatpush3.bf16.msra.mxu0 %v237_v6 }
  0x33   :  { %215 = vmatprep.subr.bf16.mxu0 %v311_v0 }
  0x36   :  { %216 = vmatpush3.bf16.msra.mxu0 %v238_v7 }
  0x37   :  { %217 = vmatprep.subr.bf16.mxu0 %v311_v0 }
  0x3a   :  { %218 = vmatpush3.bf16.msra.mxu0 %v239_v8 }
  0x3d   :  { %220 = vmatmul.mubr.bf16.vlgmr.msra.gmra.mxu0 %v240_v9 }
  0xfd   :  { %v157_v11 = vpop.f32.mrf.mxu0 }
  0xfe   :  { %v158_v12 = vadd.f32 %v184_v10, %v157_v11 }
  0xff   :  { %v221_v13 = vpop.f32.mrf.mxu0 }
 0x100   :  { %164 = vst [vmem:[#allocation7] sm:$0xff] %v158_v12 }
 0x101   :  { %v160_v14 = vpop.f32.mrf.mxu0 }
 0x102   :  { %v161_v15 = vadd.f32 %v184_v10, %v160_v14 }
 0x103   :  { %v222_v16 = vpop.f32.mrf.mxu0 }
 0x104   :  { %165 = vst [vmem:[#allocation7 + $0x8] sm:$0xff] %v161_v15 }
 0x105   :  { %292 = shalt.err (!%p289_p0)
}
 0x106   :  { %s314_s27 = smov 128   ;;  %s315_s2 = smov 8  }
 0x107   :  { %177 = dma.vmem_to_hbm [thread:$0]  %s172_s25, 256, %s351_s3, [#allocation4], %s314_s27, %s314_s27, %s315_s2  }
 0x108   :  { %305 = dma.done.wait [#allocation4], 256  }
 0x109   :  { %306 = vsyncadd [#allocation4], 4294967040 }
 0x10a   :  { %181 = vsyncpa [#allocation3], 1 }
 0x10b   :  { %182 = vsyncpa [#allocation6], 1 }
 0x10c   :  { %183 = vsyncpa [#allocation4], 1 }

</bundles_post_ra>
